<compile_context>
chip_gen: v6e
topology: v6e:2x2x1
jax: 0.10.0
libtpu: 0.0.40
codegen_flags: <defaults>
</compile_context>

<pallas_src>
import functools

import jax
import jax.numpy as jnp
from jax import lax
from jax.experimental import pallas as pl
from jax.experimental.pallas import tpu as pltpu

_LANES = 128
_SUBLANES = 8
_TARGET_BLOCK_BYTES = 4 * 1024 * 1024  # per-input block; 2 in x 2 buf = 16 MiB VMEM


def _emit_partials(p, t, nz, o_ref, block_rows):
    """Write (mask, r, r^2) partial sums folded to (8,128) vreg accumulators."""
    maskf = nz.astype(jnp.float32)
    # F.threshold(x, 0, 0): x if x > 0 else 0 (also 0 for NaN preds).
    p_thr = jnp.where(p > 0.0, p, 0.0)
    # where (not maskf*diff) so stale garbage rows in a partial tail block
    # (nz already forced False there) can never inject NaN/Inf via 0*NaN.
    r = jnp.where(nz, p_thr - t, 0.0)

    def fold(x):
        # (block_rows, 128) -> (8, 128): pure vreg-wise VPU adds, no XLU.
        return x.reshape(block_rows // _SUBLANES, _SUBLANES, _LANES).sum(axis=0)

    o_ref[0, 0] = fold(maskf)
    o_ref[0, 1] = fold(r)
    o_ref[0, 2] = fold(r * r)


def _rmse_partials_kernel(p_ref, t_ref, o_ref, *, block_rows, total_rows,
                          tail_partial):
    # Cast after load: HBM traffic stays in the native dtype (e.g. bf16).
    p = p_ref[...].astype(jnp.float32)
    t = t_ref[...].astype(jnp.float32)
    nz = t != 0.0

    if not tail_partial:
        # Fast path: every block is full; no masking anywhere.
        _emit_partials(p, t, nz, o_ref, block_rows)
        return

    i = pl.program_id(0)
    is_tail = i == pl.num_programs(0) - 1

    @pl.when(jnp.logical_not(is_tail))
    def _():
        _emit_partials(p, t, nz, o_ref, block_rows)

    @pl.when(is_tail)
    def _():
        # Only the single partial tail block pays for the row-validity mask
        # (zeroes contributions from stale rows past the end of the array).
        ridx = lax.broadcasted_iota(jnp.int32, (block_rows, _LANES), 0)
        valid = (i * block_rows + ridx) < total_rows
        _emit_partials(p, t, jnp.logical_and(nz, valid), o_ref, block_rows)


def rmse_loss(preds: jax.Array, targets: jax.Array) -> jax.Array:
    """Masked RMSE-style loss. preds/targets: same shape (e.g. NCHW), any float."""
    assert preds.shape == targets.shape
    n = int(preds.size)
    if n == 0:
        return jnp.float32(0.0)

    p_flat = preds.reshape(-1)
    t_flat = targets.reshape(-1)

    # Kernel consumes an exactly (8,128)-aligned prefix; the remainder
    # (< 8*128 + 128 elements) is reduced in plain JAX below. No jnp.pad.
    rows = (n // (_SUBLANES * _LANES)) * _SUBLANES
    kernel_elems = rows * _LANES

    sum_mask = jnp.float32(0.0)
    sum_r = jnp.float32(0.0)
    sum_r2 = jnp.float32(0.0)

    if rows > 0:
        p2 = p_flat[:kernel_elems].reshape(rows, _LANES)
        t2 = t_flat[:kernel_elems].reshape(rows, _LANES)

        itemsize = max(int(jnp.dtype(preds.dtype).itemsize), 1)
        target_rows = max(_SUBLANES, _TARGET_BLOCK_BYTES // (_LANES * itemsize))
        target_rows = (target_rows // _SUBLANES) * _SUBLANES

        if rows <= target_rows:
            block_rows = rows          # single full block, no partial blocks
        else:
            block_rows = target_rows   # ~4 MiB per input block
        num_blocks = pl.cdiv(rows, block_rows)
        tail_partial = (rows % block_rows) != 0

        kernel = functools.partial(
            _rmse_partials_kernel,
            block_rows=block_rows,
            total_rows=rows,
            tail_partial=tail_partial,
        )

        partials = pl.pallas_call(
            kernel,
            out_shape=jax.ShapeDtypeStruct(
                (num_blocks, 3, _SUBLANES, _LANES), jnp.float32),
            grid_spec=pltpu.PrefetchScalarGridSpec(
                num_scalar_prefetch=0,
                grid=(num_blocks,),
                in_specs=[
                    pl.BlockSpec((block_rows, _LANES), lambda i: (i, 0)),
                    pl.BlockSpec((block_rows, _LANES), lambda i: (i, 0)),
                ],
                out_specs=pl.BlockSpec((1, 3, _SUBLANES, _LANES),
                                       lambda i: (i, 0, 0, 0)),
            ),
            compiler_params=pltpu.CompilerParams(
                # Independent grid steps (each writes its own partial-sum
                # block): parallel is semantically exact and shards across
                # TCs where the hardware has them; no-op on 1-TC chips.
                dimension_semantics=("parallel",),
                vmem_limit_bytes=40 * 1024 * 1024,
            ),
        )(p2, t2)

        sums = jnp.sum(partials, axis=(0, 2, 3))  # (3,)
        sum_mask, sum_r, sum_r2 = sums[0], sums[1], sums[2]

    if kernel_elems < n:
        # Tiny remainder (< 1152 elements) in plain JAX; XLA fuses this.
        p_t = p_flat[kernel_elems:].astype(jnp.float32)
        t_t = t_flat[kernel_elems:].astype(jnp.float32)
        nz_t = t_t != 0.0
        r_t = jnp.where(nz_t, jnp.where(p_t > 0.0, p_t, 0.0) - t_t, 0.0)
        sum_mask = sum_mask + jnp.sum(nz_t.astype(jnp.float32))
        sum_r = sum_r + jnp.sum(r_t)
        sum_r2 = sum_r2 + jnp.sum(r_t * r_t)

    safe = jnp.where(sum_mask == 0.0, 1.0, sum_mask)
    rmse = sum_r2 / safe - (sum_r / safe) ** 2
    # num_pos == 0 -> PyTorch returns zeros; we return scalar 0.0.
    return jnp.where(sum_mask == 0.0, jnp.float32(0.0), rmse)


def _rmse_ref(preds, targets):
    p = preds.astype(jnp.float32)
    t = targets.astype(jnp.float32)
    p = jnp.where(p > 0.0, p, 0.0)
    mask = (t != 0.0).astype(jnp.float32)
    r = (p - t) * mask
    num_pos = jnp.sum(mask)
    safe = jnp.where(num_pos == 0.0, 1.0, num_pos)
    val = jnp.sum(r * r) / safe - (jnp.sum(r) / safe) ** 2
    return jnp.where(num_pos == 0.0, 0.0, val)


def _make_inputs(key, shape, zero_frac, dtype=jnp.float32):
    k1, k2, k3 = jax.random.split(key, 3)
    preds = jax.random.normal(k1, shape, dtype=jnp.float32)
    targets = jax.random.normal(k2, shape, dtype=jnp.float32)
    targets = jnp.where(jax.random.uniform(k3, shape) < zero_frac, 0.0, targets)
    return preds.astype(dtype), targets.astype(dtype)


if __name__ == "__main__":
    key = jax.random.PRNGKey(0)
    k1, k2, k3, k4 = jax.random.split(key, 4)

    # 1) Small NCHW depth-like input, exact lane multiple -> single full block.
    preds, targets = _make_inputs(k1, (2, 4, 16, 16), 0.3)
    out = rmse_loss(preds, targets)
    jax.block_until_ready(out)
    ref = _rmse_ref(preds, targets)
    assert jnp.allclose(out, ref, rtol=1e-4, atol=1e-5), (out, ref)

    # 2) Awkward size (non lane-multiple) -> JAX-side remainder path.
    preds2, targets2 = _make_inputs(k2, (2, 3, 17, 19), 0.4)
    out2 = rmse_loss(preds2, targets2)
    jax.block_until_ready(out2)
    ref2 = _rmse_ref(preds2, targets2)
    assert jnp.allclose(out2, ref2, rtol=1e-4, atol=1e-5), (out2, ref2)

    # 3) Larger input -> multiple blocks + masked partial tail block path.
    preds3, targets3 = _make_inputs(k3, (1, 4, 640, 480), 0.3)
    out3 = rmse_loss(preds3, targets3)
    jax.block_until_ready(out3)
    ref3 = _rmse_ref(preds3, targets3)
    assert jnp.allclose(out3, ref3, rtol=2e-3, atol=1e-5), (out3, ref3)

    # 4) All-zero targets -> num_pos == 0 -> loss must be exactly 0.
    preds4, _ = _make_inputs(k4, (2, 4, 16, 16), 0.3)
    out4 = rmse_loss(preds4, jnp.zeros_like(preds4))
    jax.block_until_ready(out4)
    assert jnp.allclose(out4, 0.0), out4

    # 5) bf16 inputs exercise the in-kernel cast path.
    preds5, targets5 = _make_inputs(k1, (2, 4, 16, 16), 0.3, dtype=jnp.bfloat16)
    out5 = rmse_loss(preds5, targets5)
    jax.block_until_ready(out5)
    ref5 = _rmse_ref(preds5, targets5)
    assert jnp.allclose(out5, ref5, rtol=1e-3, atol=1e-4), (out5, ref5)

    print("KERNEL_OK")
</pallas_src>

<mosaic_0001>
module attributes {stable_mosaic.version = 11 : i64} {
  func.func @_rmse_partials_kernel(%arg0: i32, %arg1: memref<16x128xf32, #tpu.memory_space<vmem>>, %arg2: memref<16x128xf32, #tpu.memory_space<vmem>>, %arg3: memref<1x3x8x128xf32, #tpu.memory_space<vmem>>) attributes {dimension_semantics = [#tpu.dimension_semantics<parallel>], iteration_bounds = array<i64: 1>, scalar_prefetch = 0 : i64, scratch_operands = 0 : i64, tpu.core_type = #tpu.core_type<tc>, window_params = [{transform_indices = @transform_0, window_bounds = array<i64: 16, 128>}, {transform_indices = @transform_1, window_bounds = array<i64: 16, 128>}, {transform_indices = @transform_2, window_bounds = array<i64: 1, 3, 8, 128>}]} {
    %c0 = arith.constant 0 : index
    %c0_0 = arith.constant 0 : index
    %0 = vector.load %arg1[%c0, %c0_0] : memref<16x128xf32, #tpu.memory_space<vmem>>, vector<16x128xf32>
    %c0_1 = arith.constant 0 : index
    %c0_2 = arith.constant 0 : index
    %1 = vector.load %arg2[%c0_1, %c0_2] : memref<16x128xf32, #tpu.memory_space<vmem>>, vector<16x128xf32>
    %cst = arith.constant 0.000000e+00 : f32
    %2 = vector.broadcast %cst : f32 to vector<16x128xf32>
    %3 = arith.cmpf one, %1, %2 : vector<16x128xf32>
    %4 = arith.extui %3 : vector<16x128xi1> to vector<16x128xi32>
    %5 = arith.sitofp %4 : vector<16x128xi32> to vector<16x128xf32>
    %cst_3 = arith.constant 0.000000e+00 : f32
    %6 = vector.broadcast %cst_3 : f32 to vector<16x128xf32>
    %7 = arith.cmpf ogt, %0, %6 : vector<16x128xf32>
    %cst_4 = arith.constant 0.000000e+00 : f32
    %8 = vector.broadcast %cst_4 : f32 to vector<16x128xf32>
    %9 = arith.select %7, %0, %8 : vector<16x128xi1>, vector<16x128xf32>
    %10 = arith.subf %9, %1 : vector<16x128xf32>
    %cst_5 = arith.constant 0.000000e+00 : f32
    %11 = vector.broadcast %cst_5 : f32 to vector<16x128xf32>
    %12 = arith.select %3, %10, %11 : vector<16x128xi1>, vector<16x128xf32>
    %13 = vector.shape_cast %5 : vector<16x128xf32> to vector<2x8x128xf32>
    %cst_6 = arith.constant dense<0.000000e+00> : vector<8x128xf32>
    %14 = vector.multi_reduction <add>, %13, %cst_6 [0] : vector<2x8x128xf32> to vector<8x128xf32>
    %c0_7 = arith.constant 0 : index
    %c0_8 = arith.constant 0 : index
    %c0_9 = arith.constant 0 : index
    %c0_10 = arith.constant 0 : index
    %15 = vector.load %arg3[%c0_7, %c0_8, %c0_9, %c0_10] : memref<1x3x8x128xf32, #tpu.memory_space<vmem>>, vector<1x1x8x128xf32>
    %16 = vector.shape_cast %15 : vector<1x1x8x128xf32> to vector<8x128xf32>
    %17 = vector.shape_cast %14 : vector<8x128xf32> to vector<1x1x8x128xf32>
    tpu.vector_store %arg3[%c0_7, %c0_8, %c0_9, %c0_10], %17 {strides = array<i32>} : memref<1x3x8x128xf32, #tpu.memory_space<vmem>>, vector<1x1x8x128xf32>,
    %18 = vector.shape_cast %12 : vector<16x128xf32> to vector<2x8x128xf32>
    %cst_11 = arith.constant dense<0.000000e+00> : vector<8x128xf32>
    %19 = vector.multi_reduction <add>, %18, %cst_11 [0] : vector<2x8x128xf32> to vector<8x128xf32>
    %c0_12 = arith.constant 0 : index
    %c1 = arith.constant 1 : index
    %c0_13 = arith.constant 0 : index
    %c0_14 = arith.constant 0 : index
    %20 = vector.load %arg3[%c0_12, %c1, %c0_13, %c0_14] : memref<1x3x8x128xf32, #tpu.memory_space<vmem>>, vector<1x1x8x128xf32>
    %21 = vector.shape_cast %20 : vector<1x1x8x128xf32> to vector<8x128xf32>
    %22 = vector.shape_cast %19 : vector<8x128xf32> to vector<1x1x8x128xf32>
    tpu.vector_store %arg3[%c0_12, %c1, %c0_13, %c0_14], %22 {strides = array<i32>} : memref<1x3x8x128xf32, #tpu.memory_space<vmem>>, vector<1x1x8x128xf32>,
    %23 = arith.mulf %12, %12 : vector<16x128xf32>
    %24 = vector.shape_cast %23 : vector<16x128xf32> to vector<2x8x128xf32>
    %cst_15 = arith.constant dense<0.000000e+00> : vector<8x128xf32>
    %25 = vector.multi_reduction <add>, %24, %cst_15 [0] : vector<2x8x128xf32> to vector<8x128xf32>
    %c0_16 = arith.constant 0 : index
    %c2 = arith.constant 2 : index
    %c0_17 = arith.constant 0 : index
    %c0_18 = arith.constant 0 : index
    %26 = vector.load %arg3[%c0_16, %c2, %c0_17, %c0_18] : memref<1x3x8x128xf32, #tpu.memory_space<vmem>>, vector<1x1x8x128xf32>
    %27 = vector.shape_cast %26 : vector<1x1x8x128xf32> to vector<8x128xf32>
    %28 = vector.shape_cast %25 : vector<8x128xf32> to vector<1x1x8x128xf32>
    tpu.vector_store %arg3[%c0_16, %c2, %c0_17, %c0_18], %28 {strides = array<i32>} : memref<1x3x8x128xf32, #tpu.memory_space<vmem>>, vector<1x1x8x128xf32>,
    return
  }
  func.func @transform_0(%arg0: i32) -> (i32, i32) {
    %c0_i32 = arith.constant 0 : i32
    %c0_i32_0 = arith.constant 0 : i32
    return %arg0, %c0_i32 : i32, i32
  }
  func.func @transform_1(%arg0: i32) -> (i32, i32) {
    %c0_i32 = arith.constant 0 : i32
    %c0_i32_0 = arith.constant 0 : i32
    return %arg0, %c0_i32 : i32, i32
  }
  func.func @transform_2(%arg0: i32) -> (i32, i32, i32, i32) {
    %c0_i32 = arith.constant 0 : i32
    %c0_i32_0 = arith.constant 0 : i32
    %c0_i32_1 = arith.constant 0 : i32
    %c0_i32_2 = arith.constant 0 : i32
    return %arg0, %c0_i32, %c0_i32_0, %c0_i32_1 : i32, i32, i32, i32
  }
}

</mosaic_0001>

<bundles_post_ra>
// kernel: tpu_custom_call.1
= control target key start
LH: loop header
LB: loop body
LE: loop exit
PB: predicated region body
PF: predicated region fallthrough
CT: control target
= control target key end

     0   :  { %7 = vsyncpa [#allocation3], 0  ;;  %s199_s0 = inlined_call_operand.hbm [shape: f32[16,128], index: 0, kind: input, shape index: {}]   ;;  %s200_s1 = inlined_call_operand.hbm [shape: f32[16,128], index: 1, kind: input, shape index: {}]   ;;  %s201_s2 = inlined_call_operand.hbm [shape: f32[1,3,8,128], index: 2, kind: output, shape index: {}]  }
   0x1   :  { %8 = vsyncpa [#allocation6], 0 }
   0x2   :  { %9 = vsyncpa [#allocation4], 0  ;;  %s160_s9 = smov [#allocation2]  }
   0x3   :  { %s15_s10 = sshll.u32 %s160_s9, 4  ;;  %s16_s10 = int_to_ptr.vmem [resolvable:$true] %s15_s10 }
   0x4   :  { %s102_s11 = scalar_lea.vmem %s16_s10, 256  ;;  %p107_p1 = scmp.lt.s32.totalorder %s16_s10, %s16_s10 }
   0x5   :  { %p103_p0 = scmp.ne.s32.totalorder %s16_s10, %s102_s11  ;;  %p108_p2 = scmp.lt.s32.totalorder %s102_s11, %s102_s11 }
   0x7   :  { %p109_p3 = por %p108_p2, %p107_p1 }
   0x9   :  { %p110_p4 = pnand %p109_p3, %p103_p0 }
   0xb   :  { %113 = shalt.err (!%p110_p4)
}
   0xc   :  { %s161_s12 = smov 128   ;;  %s162_s13 = smov 8  }
   0xd   :  { %21 = dma.hbm_to_vmem [thread:$0]  %s199_s0, 256, %s16_s10, [#allocation3], %s161_s12, %s161_s12, %s162_s13  }
   0xe   :  { %s163_s16 = smov [#allocation5]  }
   0xf   :  { %s27_s17 = sshll.u32 %s163_s16, 4  ;;  %s28_s17 = int_to_ptr.vmem [resolvable:$true] %s27_s17 }
  0x10   :  { %s122_s18 = scalar_lea.vmem %s28_s17, 256  ;;  %p127_p6 = scmp.lt.s32.totalorder %s28_s17, %s28_s17 }
  0x11   :  { %p123_p5 = scmp.ne.s32.totalorder %s28_s17, %s122_s18  ;;  %p128_p7 = scmp.lt.s32.totalorder %s122_s18, %s122_s18 }
  0x13   :  { %p129_p8 = por %p128_p7, %p127_p6 }
  0x15   :  { %p130_p9 = pnand %p129_p8, %p123_p5 }
  0x17   :  { %133 = shalt.err (!%p130_p9)
}
  0x18   :  { %33 = dma.hbm_to_vmem [thread:$0]  %s200_s1, 256, %s28_s17, [#allocation6], %s161_s12, %s161_s12, %s162_s13  }
  0x19   :  { %154 = dma.done.wait [#allocation3], 256  }
  0x1a   :  { %155 = vsyncadd [#allocation3], 4294967040 }
  0x1b   :  { %156 = dma.done.wait [#allocation6], 256  }
  0x1c   :  { %157 = vsyncadd [#allocation6], 4294967040  ;;  %v42_v0 = vld [vmem:[#allocation5] sm:$0xff]  ;;  %v43_v1 = vld [vmem:[#allocation5 + $0x8] sm:$0xff]  ;;  %v164_v4 = vmov 0.0   ;;  %s165_s0 = smov [#allocation7]  }
  0x1d   :  { %v40_v2 = vld [vmem:[#allocation2] sm:$0xff]  ;;  %vm44_vm0 = vcmp.ne.f32.partialorder %v42_v0, 0.0  ;;  %vm45_vm1 = vcmp.ne.f32.partialorder %v43_v1, 0.0  ;;  %v41_v3 = vld [vmem:[#allocation2 + $0x8] sm:$0xff]  ;;  %s73_s1 = sshll.u32 %s165_s0, 4  ;;  %s74_s1 = int_to_ptr.vmem [resolvable:$true] %s73_s1 }
  0x1e   :  { %vm50_vm2 = vcmp.gt.f32.partialorder %v40_v2, 0.0  ;;  %v86_v5 = vsel %vm44_vm0, 1.0, %v164_v4  ;;  %v87_v6 = vsel %vm45_vm1, 1.0, %v164_v4  ;;  %vm51_vm3 = vcmp.gt.f32.partialorder %v41_v3, 0.0  ;;  %s134_s21 = scalar_lea.vmem %s74_s1, 384  ;;  %p139_p11 = scmp.lt.s32.totalorder %s74_s1, %s74_s1 }
  0x1f   :  { %v52_v7 = vsel %vm50_vm2, %v40_v2, 0.0  ;;  %v58_v8 = vadd.f32 %v87_v6, %v86_v5  ;;  %v53_v9 = vsel %vm51_vm3, %v41_v3, 0.0  ;;  %p135_p10 = scmp.ne.s32.totalorder %s74_s1, %s134_s21  ;;  %p140_p12 = scmp.lt.s32.totalorder %s134_s21, %s134_s21 }
  0x20   :  { %v54_v10 = vsub.f32 %v52_v7, %v42_v0  ;;  %v55_v11 = vsub.f32 %v53_v9, %v43_v1 }
  0x21   :  { %59 = vst [vmem:[#allocation7] sm:$0xff] %v58_v8  ;;  %p141_p13 = por %p140_p12, %p139_p11 }
  0x22   :  { %v56_v12 = vsel %vm44_vm0, %v54_v10, 0.0  ;;  %v57_v13 = vsel %vm45_vm1, %v55_v11, 0.0 }
  0x23   :  { %v63_v14 = vmul.f32 %v56_v12, %v56_v12  ;;  %v60_v15 = vadd.f32 %v57_v13, %v56_v12  ;;  %v64_v16 = vmul.f32 %v57_v13, %v57_v13  ;;  %p142_p0 = pnand %p141_p13, %p135_p10 }
  0x25   :  { %62 = vst [vmem:[#allocation7 + $0x8] sm:$0xff] %v60_v15  ;;  %v65_v17 = vadd.f32 %v64_v16, %v63_v14 }
  0x27   :  { %67 = vst [vmem:[#allocation7 + $0x10] sm:$0xff] %v65_v17 }
  0x28   :  { %145 = shalt.err (!%p142_p0)
}
  0x29   :  { %79 = dma.vmem_to_hbm [thread:$0]  %s74_s1, 384, %s201_s2, [#allocation4], %s161_s12, %s161_s12, %s162_s13  }
  0x2a   :  { %158 = dma.done.wait [#allocation4], 384  }
  0x2b   :  { %159 = vsyncadd [#allocation4], 4294966912 }
  0x2c   :  { %83 = vsyncpa [#allocation3], 1 }
  0x2d   :  { %84 = vsyncpa [#allocation6], 1 }
  0x2e   :  { %85 = vsyncpa [#allocation4], 1 }

</bundles_post_ra>
